<compile_context>
chip_gen: v5e
topology: v5e:2x2
jax: 0.10.0
libtpu: 0.0.40
codegen_flags: <defaults>
</compile_context>

<pallas_src>
import functools

import numpy as np
import jax
import jax.numpy as jnp
from jax.experimental import pallas as pl
from jax.experimental.pallas import tpu as pltpu


_VMEM_LIMIT = 48 * 1024 * 1024  # safe on v5e/v6e (128 MiB phys) and v7x (64 MiB)


def _pick_tile(dim, pref):
    """`pref` if it evenly divides `dim`, else the full dim.

    `pref` is a multiple of the hardware tiling (8 sublanes / 128 lanes) and a
    full-extent block is always legal, so the (8,128) BlockSpec constraint
    holds either way.
    """
    if dim <= pref or dim % pref != 0:
        return dim
    return pref


# ----------------------------------------------------------------------------
# Kernel A: tiled matmul with f32 accumulator + bias / ReLU epilogue
#           (GCN layer 1:  A_hat @ W1cat, since X = I)
# ----------------------------------------------------------------------------
def _fused_matmul_kernel(*refs, relu, has_bias):
    if has_bias:
        a_ref, b_ref, bias_ref, o_ref, acc_ref = refs
    else:
        a_ref, b_ref, o_ref, acc_ref = refs
        bias_ref = None

    k = pl.program_id(2)

    @pl.when(k == 0)
    def _():
        acc_ref[...] = jnp.zeros_like(acc_ref)

    acc_ref[...] += jnp.dot(a_ref[...], b_ref[...],
                            preferred_element_type=jnp.float32)

    @pl.when(k == pl.num_programs(2) - 1)
    def _():
        out = acc_ref[...]
        if bias_ref is not None:
            out = out + bias_ref[...]
        if relu:
            out = jnp.maximum(out, 0.0)
        o_ref[...] = out.astype(o_ref.dtype)


def fused_matmul(a, b, bias=None, relu=False, out_dtype=jnp.float32,
                 tm=256, tn=256, tk=512):
    """out = act(a @ b [+ bias]) with bf16-friendly tiled MXU matmul."""
    M, K = a.shape
    K2, N = b.shape
    assert K == K2
    tm = _pick_tile(M, tm)
    tn = _pick_tile(N, tn)
    tk = _pick_tile(K, tk)
    grid = (M // tm, N // tn, K // tk)

    in_specs = [pl.BlockSpec((tm, tk), lambda i, j, k: (i, k)),
                pl.BlockSpec((tk, tn), lambda i, j, k: (k, j))]
    args = [a, b]
    if bias is not None:
        in_specs.append(pl.BlockSpec((1, tn), lambda i, j, k: (0, j)))
        args.append(bias.reshape(1, N).astype(jnp.float32))

    kernel = functools.partial(_fused_matmul_kernel, relu=relu,
                               has_bias=bias is not None)
    return pl.pallas_call(
        kernel,
        out_shape=jax.ShapeDtypeStruct((M, N), out_dtype),
        grid=grid,
        in_specs=in_specs,
        out_specs=pl.BlockSpec((tm, tn), lambda i, j, k: (i, j)),
        scratch_shapes=[pltpu.VMEM((tm, tn), jnp.float32)],
        compiler_params=pltpu.CompilerParams(
            dimension_semantics=("parallel", "parallel", "arbitrary"),
            vmem_limit_bytes=_VMEM_LIMIT),
    )(*args)


# ----------------------------------------------------------------------------
# Kernel B: fully fused GCN layer 2 + latent combine + UnitNorm + decoders.
#   Zc  = A_hat @ (H1 @ W2_bd) + b2           (chained matmul, no HBM bounce)
#   z   = z_avg + sqrt(beta)*eps1 + z_std @ eps2
#   z   = UnitNorm(z)   (all-zero rows -> precomputed gaussian noise)
#   out = z @ W_dec     (W_dec = [Wx | Wy | 0-pad], lane-dense 128 multiple)
# ----------------------------------------------------------------------------
def _gcn2_latent_decode_kernel(a_ref, h_ref, w2_ref, b2_ref, eps1_ref,
                               eps2_ref, rnd_ref, wdec_ref, o_ref, acc_ref,
                               *, hidden, sqrt_beta):
    k = pl.program_id(1)

    @pl.when(k == 0)
    def _():
        acc_ref[...] = jnp.zeros_like(acc_ref)

    # t = H1[k_block] @ W2_bd  (small, recomputed per row-tile; cheap vs HBM)
    t = jnp.dot(h_ref[...], w2_ref[...], preferred_element_type=jnp.float32)
    acc_ref[...] += jnp.dot(a_ref[...], t.astype(a_ref.dtype),
                            preferred_element_type=jnp.float32)

    @pl.when(k == pl.num_programs(1) - 1)
    def _():
        zc = acc_ref[...] + b2_ref[...]          # (tm, 2H) f32
        z_avg = zc[:, :hidden]
        z_std = zc[:, hidden:]

        z = (z_avg
             + sqrt_beta * eps1_ref[...]
             + jnp.dot(z_std, eps2_ref[...],
                       preferred_element_type=jnp.float32))

        # UnitNorm: rows that are entirely zero are replaced with gaussian
        # noise (precomputed host-side), then L2 row-normalized.
        ss = jnp.sum(z * z, axis=1, keepdims=True)
        z = jnp.where(ss > 0.0, z, rnd_ref[...])
        ss = jnp.sum(z * z, axis=1, keepdims=True)
        z = z * jax.lax.rsqrt(jnp.maximum(ss, 1e-30))

        # TODO(synk): nn.Dropout(z) before the decoders is training-only.
        o_ref[...] = jnp.dot(z, wdec_ref[...],
                             preferred_element_type=jnp.float32
                             ).astype(o_ref.dtype)


def gcn2_latent_decode(a_hat, h1, w2_bd, b2, eps1, eps2, rnd, w_dec, beta,
                       tm=256, tk=512):
    M, K = a_hat.shape            # (num_nodes, num_nodes)
    K2, D2 = h1.shape             # (num_nodes, 2H)
    H = D2 // 2
    F_pad = w_dec.shape[1]
    assert K == K2 and w2_bd.shape == (D2, D2)
    tm = _pick_tile(M, tm)
    tk = _pick_tile(K, tk)
    grid = (M // tm, K // tk)

    kernel = functools.partial(_gcn2_latent_decode_kernel, hidden=H,
                               sqrt_beta=float(np.sqrt(beta)))
    return pl.pallas_call(
        kernel,
        out_shape=jax.ShapeDtypeStruct((M, F_pad), jnp.float32),
        grid=grid,
        in_specs=[
            pl.BlockSpec((tm, tk), lambda i, k: (i, k)),      # A_hat
            pl.BlockSpec((tk, D2), lambda i, k: (k, 0)),      # H1 rows
            pl.BlockSpec((D2, D2), lambda i, k: (0, 0)),      # W2 block-diag
            pl.BlockSpec((1, D2), lambda i, k: (0, 0)),       # b2
            pl.BlockSpec((tm, H), lambda i, k: (i, 0)),       # eps1
            pl.BlockSpec((H, H), lambda i, k: (0, 0)),        # eps2
            pl.BlockSpec((tm, H), lambda i, k: (i, 0)),       # UnitNorm noise
            pl.BlockSpec((H, F_pad), lambda i, k: (0, 0)),    # [Wx | Wy | 0]
        ],
        out_specs=pl.BlockSpec((tm, F_pad), lambda i, k: (i, 0)),
        scratch_shapes=[pltpu.VMEM((tm, D2), jnp.float32)],
        compiler_params=pltpu.CompilerParams(
            dimension_semantics=("parallel", "arbitrary"),
            vmem_limit_bytes=_VMEM_LIMIT),
    )(a_hat, h1, w2_bd, b2.reshape(1, D2).astype(jnp.float32),
      eps1, eps2, rnd, w_dec)


# ----------------------------------------------------------------------------
# Model pieces (glue around the Pallas kernels)
# ----------------------------------------------------------------------------
def normalized_adj(edge_index, num_nodes):
    """GCN-normalized adjacency D^-1/2 (A + I) D^-1/2 (dense, plain JAX)."""
    A = jnp.zeros((num_nodes, num_nodes), jnp.float32)
    A = A.at[edge_index[0], edge_index[1]].set(1.0)
    A = A.at[edge_index[1], edge_index[0]].set(1.0)
    A = A + jnp.eye(num_nodes, dtype=jnp.float32)
    deg = A.sum(axis=1)
    d_inv_sqrt = 1.0 / jnp.sqrt(deg)
    return A * d_inv_sqrt[:, None] * d_inv_sqrt[None, :]


def stochastic_svga_forward(edge_index, num_nodes, params, eps1, eps2, rnd,
                            beta, num_features, num_classes):
    H = params["enc_avg"]["W1"].shape[1]
    a_hat = normalized_adj(edge_index, num_nodes).astype(jnp.bfloat16)

    # --- batched encoders, layer 1 ------------------------------------------
    # Features(version='diag') => X = I_N, so X @ W1 == W1 (no matmul needed).
    W1_cat = jnp.concatenate([params["enc_avg"]["W1"],
                              params["enc_std"]["W1"]], axis=1)   # (N, 2H)
    b1_cat = jnp.concatenate([params["enc_avg"]["b1"],
                              params["enc_std"]["b1"]])           # (2H,)
    # TODO(synk): nn.Dropout between GCN layers is training-only; identity here.
    h1 = fused_matmul(a_hat, W1_cat.astype(jnp.bfloat16), bias=b1_cat,
                      relu=True, out_dtype=jnp.bfloat16)          # (N, 2H)

    # --- batched encoders layer 2 + latent + UnitNorm + decoders (one call) --
    W2_bd = jnp.zeros((2 * H, 2 * H), jnp.float32)
    W2_bd = W2_bd.at[:H, :H].set(params["enc_avg"]["W2"])
    W2_bd = W2_bd.at[H:, H:].set(params["enc_std"]["W2"])
    b2_cat = jnp.concatenate([params["enc_avg"]["b2"],
                              params["enc_std"]["b2"]])

    F_total = num_features + num_classes
    F_pad = max(128, ((F_total + 127) // 128) * 128)
    W_dec = jnp.zeros((H, F_pad), jnp.float32)
    W_dec = W_dec.at[:, :F_total].set(
        jnp.concatenate([params["Wx"], params["Wy"]], axis=1))

    out = gcn2_latent_decode(a_hat, h1, W2_bd.astype(jnp.bfloat16), b2_cat,
                             eps1, eps2, rnd, W_dec, beta)        # (N, F_pad)

    x_hat = out[:, :num_features]
    y_hat = out[:, num_features:F_total]
    return x_hat, y_hat


def reference_forward(edge_index, num_nodes, params, eps1, eps2, rnd, beta):
    """Pure-JAX f32 reference mirroring the PyTorch forward (inference)."""
    a = normalized_adj(edge_index, num_nodes)

    def enc(p):
        h1 = jax.nn.relu(a @ p["W1"] + p["b1"])
        return a @ (h1 @ p["W2"]) + p["b2"]

    z_avg = enc(params["enc_avg"])
    z_std = enc(params["enc_std"])
    z = z_avg + np.sqrt(beta) * eps1 + z_std @ eps2
    ss = jnp.sum(z * z, axis=1, keepdims=True)
    z = jnp.where(ss > 0, z, rnd)
    z = z / jnp.sqrt(jnp.sum(z * z, axis=1, keepdims=True))
    return z @ params["Wx"], z @ params["Wy"]


# ----------------------------------------------------------------------------
# Deterministic setup + run
# ----------------------------------------------------------------------------
def glorot(key, shape):
    fan_in, fan_out = shape
    s = float(np.sqrt(6.0 / (fan_in + fan_out)))
    return jax.random.uniform(key, shape, jnp.float32, -s, s)


if __name__ == "__main__":
    N = 16       # num_nodes (diag features -> encoder input dim = N)
    F_X = 8      # num_features decoded by x_decoder
    C = 4        # num_classes
    H = 32       # hidden_size
    beta = 0.1

    key = jax.random.PRNGKey(0)
    keys = jax.random.split(key, 10)

    # ring graph edge_index [2, N]
    src = jnp.arange(N, dtype=jnp.int32)
    dst = (src + 1) % N
    edge_index = jnp.stack([src, dst])

    params = {
        "enc_avg": dict(W1=glorot(keys[0], (N, H)),
                        b1=jnp.zeros((H,), jnp.float32),
                        W2=glorot(keys[1], (H, H)),
                        b2=jnp.zeros((H,), jnp.float32)),
        "enc_std": dict(W1=glorot(keys[2], (N, H)),
                        b1=jnp.zeros((H,), jnp.float32),
                        W2=glorot(keys[3], (H, H)),
                        b2=jnp.zeros((H,), jnp.float32)),
        "Wx": glorot(keys[4], (H, F_X)),   # x_decoder weight (stored transposed)
        "Wy": glorot(keys[5], (H, C)),     # y_decoder weight (stored transposed)
    }

    eps1 = jax.random.normal(keys[6], (N, H), jnp.float32)   # randn_like(z_avg)
    eps2 = jax.random.normal(keys[7], (H, H), jnp.float32)   # randn(H, H)
    rnd = jax.random.normal(keys[8], (N, H), jnp.float32)    # UnitNorm fallback

    x_hat, y_hat = stochastic_svga_forward(edge_index, N, params,
                                           eps1, eps2, rnd, beta, F_X, C)
    jax.block_until_ready((x_hat, y_hat))

    assert x_hat.shape == (N, F_X) and y_hat.shape == (N, C)
    assert bool(jnp.all(jnp.isfinite(x_hat))) and bool(jnp.all(jnp.isfinite(y_hat)))

    # Correctness against the pure-JAX f32 reference (bf16 matmul tolerance).
    x_ref, y_ref = reference_forward(edge_index, N, params, eps1, eps2, rnd, beta)
    assert bool(jnp.allclose(x_hat, x_ref, rtol=5e-2, atol=5e-2))
    assert bool(jnp.allclose(y_hat, y_ref, rtol=5e-2, atol=5e-2))

    print("KERNEL_OK")
</pallas_src>

<mosaic_0001>
module attributes {stable_mosaic.version = 11 : i64} {
  func.func @_fused_matmul_kernel(%arg0: i32, %arg1: i32, %arg2: i32, %arg3: memref<16x16xbf16, #tpu.memory_space<vmem>>, %arg4: memref<16x64xbf16, #tpu.memory_space<vmem>>, %arg5: memref<1x64xf32, #tpu.memory_space<vmem>>, %arg6: memref<16x64xbf16, #tpu.memory_space<vmem>>, %arg7: memref<16x64xf32, #tpu.memory_space<vmem>>) attributes {dimension_semantics = [#tpu.dimension_semantics<parallel>, #tpu.dimension_semantics<parallel>, #tpu.dimension_semantics<arbitrary>], iteration_bounds = array<i64: 1, 1, 1>, scalar_prefetch = 0 : i64, scratch_operands = 1 : i64, tpu.core_type = #tpu.core_type<tc>, window_params = [{transform_indices = @transform_0, window_bounds = array<i64: 16, 16>}, {transform_indices = @transform_1, window_bounds = array<i64: 16, 64>}, {transform_indices = @transform_2, window_bounds = array<i64: 1, 64>}, {transform_indices = @transform_3, window_bounds = array<i64: 16, 64>}]} {
    %c0_i32 = arith.constant 0 : i32
    %0 = arith.cmpi eq, %arg2, %c0_i32 : i32
    %1 = arith.extui %0 : i1 to i32
    %c0_i32_0 = arith.constant 0 : i32
    %2 = arith.cmpi ne, %1, %c0_i32_0 : i32
    scf.if %2 {
      %cst_10 = arith.constant 0.000000e+00 : f32
      %12 = vector.broadcast %cst_10 : f32 to vector<16x64xf32>
      %c0_11 = arith.constant 0 : index
      %c0_12 = arith.constant 0 : index
      %13 = vector.load %arg7[%c0_11, %c0_12] : memref<16x64xf32, #tpu.memory_space<vmem>>, vector<16x64xf32>
      tpu.vector_store %arg7[%c0_11, %c0_12], %12 {strides = array<i32>} : memref<16x64xf32, #tpu.memory_space<vmem>>, vector<16x64xf32>,
    } else {
    }
    %c0 = arith.constant 0 : index
    %c0_1 = arith.constant 0 : index
    %3 = vector.load %arg7[%c0, %c0_1] : memref<16x64xf32, #tpu.memory_space<vmem>>, vector<16x64xf32>
    %c0_2 = arith.constant 0 : index
    %c0_3 = arith.constant 0 : index
    %4 = vector.load %arg3[%c0_2, %c0_3] : memref<16x16xbf16, #tpu.memory_space<vmem>>, vector<16x16xbf16>
    %c0_4 = arith.constant 0 : index
    %c0_5 = arith.constant 0 : index
    %5 = vector.load %arg4[%c0_4, %c0_5] : memref<16x64xbf16, #tpu.memory_space<vmem>>, vector<16x64xbf16>
    %cst = arith.constant dense<0.000000e+00> : vector<16x64xf32>
    %6 = tpu.matmul %4, %5, %cst {dimension_numbers = #tpu.dot_dimension_numbers<[1], [0], [0], [1], [0, 0, 1, 1], [], []>} : vector<16x16xbf16>, vector<16x64xbf16>, vector<16x64xf32> -> vector<16x64xf32>
    %7 = arith.addf %3, %6 : vector<16x64xf32>
    %c0_6 = arith.constant 0 : index
    %c0_7 = arith.constant 0 : index
    %8 = vector.load %arg7[%c0_6, %c0_7] : memref<16x64xf32, #tpu.memory_space<vmem>>, vector<16x64xf32>
    tpu.vector_store %arg7[%c0_6, %c0_7], %7 {strides = array<i32>} : memref<16x64xf32, #tpu.memory_space<vmem>>, vector<16x64xf32>,
    %c0_i32_8 = arith.constant 0 : i32
    %9 = arith.cmpi eq, %arg2, %c0_i32_8 : i32
    %10 = arith.extui %9 : i1 to i32
    %c0_i32_9 = arith.constant 0 : i32
    %11 = arith.cmpi ne, %10, %c0_i32_9 : i32
    scf.if %11 {
      %c0_10 = arith.constant 0 : index
      %c0_11 = arith.constant 0 : index
      %12 = vector.load %arg7[%c0_10, %c0_11] : memref<16x64xf32, #tpu.memory_space<vmem>>, vector<16x64xf32>
      %c0_12 = arith.constant 0 : index
      %c0_13 = arith.constant 0 : index
      %13 = vector.load %arg5[%c0_12, %c0_13] : memref<1x64xf32, #tpu.memory_space<vmem>>, vector<1x64xf32>
      %14 = vector.broadcast %13 : vector<1x64xf32> to vector<16x64xf32>
      %15 = arith.addf %12, %14 : vector<16x64xf32>
      %cst_14 = arith.constant 0.000000e+00 : f32
      %16 = vector.broadcast %cst_14 : f32 to vector<16x64xf32>
      %17 = arith.maximumf %15, %16 : vector<16x64xf32>
      %18 = arith.truncf %17 : vector<16x64xf32> to vector<16x64xbf16>
      %c0_15 = arith.constant 0 : index
      %c0_16 = arith.constant 0 : index
      %19 = vector.load %arg6[%c0_15, %c0_16] : memref<16x64xbf16, #tpu.memory_space<vmem>>, vector<16x64xbf16>
      tpu.vector_store %arg6[%c0_15, %c0_16], %18 {strides = array<i32>} : memref<16x64xbf16, #tpu.memory_space<vmem>>, vector<16x64xbf16>,
    } else {
    }
    return
  }
  func.func @transform_0(%arg0: i32, %arg1: i32, %arg2: i32) -> (i32, i32) {
    %c0_i32 = arith.constant 0 : i32
    return %arg0, %arg2 : i32, i32
  }
  func.func @transform_1(%arg0: i32, %arg1: i32, %arg2: i32) -> (i32, i32) {
    %c0_i32 = arith.constant 0 : i32
    return %arg2, %arg1 : i32, i32
  }
  func.func @transform_2(%arg0: i32, %arg1: i32, %arg2: i32) -> (i32, i32) {
    %c0_i32 = arith.constant 0 : i32
    %c0_i32_0 = arith.constant 0 : i32
    return %c0_i32, %arg1 : i32, i32
  }
  func.func @transform_3(%arg0: i32, %arg1: i32, %arg2: i32) -> (i32, i32) {
    %c0_i32 = arith.constant 0 : i32
    return %arg0, %arg1 : i32, i32
  }
}

</mosaic_0001>

<bundles_post_ra>
// kernel: tpu_custom_call.1
= control target key start
LH: loop header
LB: loop body
LE: loop exit
PB: predicated region body
PF: predicated region fallthrough
CT: control target
= control target key end

     0   :  { %8 = vsyncpa [#allocation4], 0  ;;  %s280_s0 = inlined_call_operand.hbm [shape: bf16[16,16], index: 0, kind: input, shape index: {}]   ;;  %s281_s1 = inlined_call_operand.hbm [shape: bf16[16,64], index: 1, kind: input, shape index: {}]   ;;  %s282_s2 = inlined_call_operand.vmem [shape: f32[1,64], index: 2, kind: input, shape index: {}]   ;;  %s283_s3 = inlined_call_operand.hbm [shape: bf16[16,64], index: 3, kind: output, shape index: {}]  }
   0x1   :  { %9 = vsyncpa [#allocation7], 0 }
   0x2   :  { %10 = vsyncpa [#allocation5], 0  ;;  %s15_s14 = sshll.u32 %s280_s0, 4  ;;  %s229_s15 = smov [#allocation3]   ;;  %s16_s14 = int_to_ptr.hbm [resolvable:$true] %s15_s14 }
   0x3   :  { %s17_s16 = sshll.u32 %s229_s15, 4  ;;  %s28_s19 = sshll.u32 %s281_s1, 4  ;;  %s18_s16 = int_to_ptr.vmem [resolvable:$true] %s17_s16  ;;  %s29_s19 = int_to_ptr.hbm [resolvable:$true] %s28_s19 }
   0x4   :  { %s230_s20 = smov 64   ;;  %s231_s21 = smov 4  }
   0x5   :  { %23 = dma.hbm_to_vmem [thread:$0]  %s16_s14, 128, %s18_s16, [#allocation4], %s230_s20, %s230_s20, %s231_s21  }
   0x6   :  { %s232_s22 = smov [#allocation6]  }
   0x7   :  { %s30_s23 = sshll.u32 %s232_s22, 4  ;;  %s31_s23 = int_to_ptr.vmem [resolvable:$true] %s30_s23 }
   0x8   :  { %36 = dma.hbm_to_vmem [thread:$0]  %s29_s19, 128, %s31_s23, [#allocation7], %s230_s20, %s230_s20, %s231_s21  }
   0x9   :  { %223 = dma.done.wait [#allocation4], 128  }
   0xa   :  { %224 = vsyncadd [#allocation4], 4294967168 }
   0xb   :  { %225 = dma.done.wait [#allocation7], 128  }
   0xc   :  { %226 = vsyncadd [#allocation7], 4294967168  ;;  %vm52_vm0 = vcmask 523264   ;;  %v233_v0 = vmov 0.0   ;;  %v143_v1 = vld [vmem:[#allocation6] sm:$0xff]  ;;  %v142_v2 = vld [vmem:[#allocation3] sm:$0xff] }
   0xd   :  { %53 = vst.msk [vmem:[#allocation2] sm:$0xff] %vm52_vm0, %v233_v0  ;;  %83 = vmatpush.bf16.msra.mxu0 %v143_v1  ;;  %vm72_vm1 = vcmask 130048   ;;  %v150_v7 = vld [vmem:[%s282_s2] ss:$0 sm:$0xff]  ;;  %vm110_vm2 = vcmask 519168   ;;  %s234_s24 = smov [#allocation8]  }
   0xe   :  { %54 = vst.msk [vmem:[#allocation2 + $0x8] sm:$0xff] %vm52_vm0, %v233_v0  ;;  %s117_s25 = sshll.u32 %s234_s24, 4  ;;  %s119_s28 = sshll.u32 %s283_s3, 4  ;;  %s118_s25 = int_to_ptr.vmem [resolvable:$true] %s117_s25  ;;  %s120_s28 = int_to_ptr.hbm [resolvable:$true] %s119_s28 }
  0x10   :  { %141 = vmatmul.msk.bf16.vlgmr.msra.gmra.mxu0 %vm72_vm1, %v142_v2 }
  0x14   :  { %v55_v3 = vld [vmem:[#allocation2] sm:$0xff] }
  0x15   :  { %v56_v6 = vld [vmem:[#allocation2 + $0x8] sm:$0xff] }
  0x8d   :  { %v85_v4 = vpop.f32.mrf.mxu0 }
  0x8e   :  { %v90_v5 = vadd.f32 %v85_v4, %v55_v3 }
  0x90   :  { %93 = vst.msk [vmem:[#allocation2] sm:$0xff] %vm52_vm0, %v90_v5 }
  0x95   :  { %v87_v8 = vpop.f32.mrf.mxu0 }
  0x96   :  { %v91_v9 = vadd.f32 %v87_v8, %v56_v6 }
  0x97   :  { %v98_v10 = vld [vmem:[#allocation2] sm:$0xff] }
  0x98   :  { %94 = vst.msk [vmem:[#allocation2 + $0x8] sm:$0xff] %vm52_vm0, %v91_v9  ;;  %v104_v11 = vadd.f32 %v150_v7, %v98_v10 }
  0x9a   :  { %v106_v12 = vmax.f32 %v104_v11, 0.0 }
  0x9c   :  { %v108_v13 = vpack.c.bf16 %v106_v12, %v106_v12 }
  0x9e   :  { %111 = vst.msk [vmem:[#allocation8] sm:$0xf] %vm110_vm2, %v108_v13 }
  0x9f   :  { %v99_v14 = vld [vmem:[#allocation2 + $0x8] sm:$0xff] }
  0xa0   :  { %v105_v15 = vadd.f32 %v150_v7, %v99_v14 }
  0xa2   :  { %v107_v16 = vmax.f32 %v105_v15, 0.0 }
  0xa4   :  { %v109_v17 = vpack.c.bf16 %v107_v16, %v107_v16 }
  0xa6   :  { %112 = vst.msk [vmem:[#allocation8 + $0x4] sm:$0xf] %vm110_vm2, %v109_v17 }
  0xa7   :  { %125 = dma.vmem_to_hbm [thread:$0]  %s118_s25, 128, %s120_s28, [#allocation5], %s230_s20, %s230_s20, %s231_s21  }
  0xa8   :  { %227 = dma.done.wait [#allocation5], 128  }
  0xa9   :  { %228 = vsyncadd [#allocation5], 4294967168 }
  0xaa   :  { %130 = vsyncpa [#allocation4], 1 }
  0xab   :  { %131 = vsyncpa [#allocation7], 1 }
  0xac   :  { %132 = vsyncpa [#allocation5], 1 }

</bundles_post_ra>
